<compile_context>
chip_gen: v6e
topology: v6e:2x2x1
jax: 0.10.0
libtpu: 0.0.40
codegen_flags: <defaults>
</compile_context>

<pallas_src>
import functools

import jax
import jax.numpy as jnp
from jax import lax
from jax.experimental import pallas as pl
from jax.experimental.pallas import tpu as pltpu


def _round_up(x, m):
    return (x + m - 1) // m * m


def cbow_kernel(idx_ref, emb_ref, w_ref, b_ref, out_ref, mean_f32, mean_bf,
                *, tb, ctx_len, cache_mean):
    # idx_ref  : (B_pad*C,)   int32 SMEM (scalar-prefetched, flat)
    # emb_ref  : (V, E_pad)   f32   VMEM (whole array, single resident buffer)
    # w_ref    : (TV, E_pad)  bf16  VMEM (streamed, double-buffered)
    # b_ref    : (1, TV)      f32   VMEM
    # out_ref  : (TB, TV)     f32   VMEM (lane-dense, TV % 128 == 0)
    # mean_f32 : (TB, E_pad)  f32   VMEM scratch
    # mean_bf  : (TB, E_pad)  bf16  VMEM scratch (cached MXU operand)
    e_pad = mean_f32.shape[1]
    inv_c = jnp.float32(1.0 / ctx_len)

    # All program_id reads are at kernel top level (compile fix).
    base = pl.program_id(0) * tb          # first batch row of this batch tile
    j = pl.program_id(1)                  # vocab-tile index

    def compute_mean():
        # Vectorized gather + mean: 8 rows per iteration, one (8, E_pad) store.
        def group_body(g, carry):
            row0 = base + g * 8
            rows = []
            for r in range(8):                       # static unroll (8 rows)
                acc = jnp.zeros((1, e_pad), jnp.float32)
                for c in range(ctx_len):             # static unroll (small C)
                    tok = idx_ref[(row0 + r) * ctx_len + c]   # scalar from SMEM
                    acc = acc + emb_ref[pl.ds(tok, 1), :]     # (1, E_pad) gather
                rows.append(acc)
            block = jnp.concatenate(rows, axis=0) * inv_c     # (8, E_pad) f32
            mean_f32[pl.ds(g * 8, 8), :] = block
            mean_bf[pl.ds(g * 8, 8), :] = block.astype(jnp.bfloat16)
            return carry

        lax.fori_loop(0, tb // 8, group_body, 0)
        # TODO(synk): bound the loop to the real row count of the last batch
        # tile (pass B as a scalar) to skip wasted gathers on padded rows.

    if cache_mean:
        # Mean computed once per batch tile, reused across all vocab tiles
        # (vocab axis must be "arbitrary").
        pl.when(j == 0)(compute_mean)
    else:
        # Single batch tile / tiny gather: recompute per vocab tile so both
        # grid axes can be "parallel" (v7x megacore splits the vocab tiles).
        compute_mean()

    # logits = mean_emb @ W_tile^T + bias_tile (bf16 operands, f32 accumulate).
    logits = lax.dot_general(
        mean_bf[...], w_ref[...],
        dimension_numbers=(((1,), (1,)), ((), ())),           # contract on E
        preferred_element_type=jnp.float32)                   # (TB, TV) f32
    out_ref[...] = logits + b_ref[...]


def cbow_forward(indices, emb_table, weight, bias):
    B, C = indices.shape
    V, E = emb_table.shape
    assert weight.shape == (V, E) and bias.shape == (V,)

    # Tile sizes: lane-dense E and TV, sublane-aligned TB (multiple of 8).
    E_pad = _round_up(E, 128)
    TB = min(512, _round_up(B, 8))
    B_pad = _round_up(B, TB)
    TV = min(2048, _round_up(V, 128))
    V_pad = _round_up(V, TV)
    n_bt, n_vt = B_pad // TB, V_pad // TV

    # Flat 1-D int32 indices (SMEM stays at raw size; padded rows gather row 0).
    idx_flat = jnp.zeros((B_pad * C,), jnp.int32).at[: B * C].set(
        indices.astype(jnp.int32).reshape(-1))

    # Column-pad the table to lane-dense E_pad only (no row padding needed).
    emb_p = emb_table.astype(jnp.float32)
    if E_pad != E:
        emb_p = jnp.pad(emb_p, ((0, 0), (0, E_pad - E)))
    # Weight: bf16 once, row-padded to V_pad and column-padded to E_pad.
    w_p = jnp.pad(weight.astype(jnp.bfloat16), ((0, V_pad - V), (0, E_pad - E)))
    b_p = jnp.zeros((1, V_pad), jnp.float32).at[0, :V].set(bias.astype(jnp.float32))

    # Cache the mean across vocab tiles only when it is worth giving up the
    # vocab-parallel axis (multiple batch tiles or a non-trivial gather).
    cache_mean = (n_bt > 1) or (TB * C > 1024)
    dims = ("parallel", "arbitrary") if cache_mean else ("parallel", "parallel")

    # VMEM budget: table single-buffered, streamed tiles double-buffered.
    needed = (V * E_pad * 4              # resident f32 embedding table
              + 2 * TV * E_pad * 2       # bf16 weight tiles
              + 2 * TV * 4               # bias tiles
              + 2 * TB * TV * 4          # output tiles
              + TB * E_pad * 4           # mean scratch (f32)
              + TB * E_pad * 2)          # mean scratch (bf16)
    try:
        cap = pltpu.get_tpu_info().vmem_capacity_bytes
    except Exception:
        cap = 64 * 2**20                 # v7x per-TensorCore VMEM (safe floor)
    vmem_limit = int(min(cap, max(32 * 2**20, needed + (4 * 2**20))))

    grid_spec = pltpu.PrefetchScalarGridSpec(
        num_scalar_prefetch=1,
        grid=(n_bt, n_vt),
        in_specs=[
            # Whole table resident in VMEM, single buffer (no pipelining).
            pl.BlockSpec(memory_space=pltpu.MemorySpace.VMEM),
            pl.BlockSpec((TV, E_pad), lambda i, j, idx: (j, 0)),   # weight tile
            pl.BlockSpec((1, TV), lambda i, j, idx: (0, j)),       # bias tile
        ],
        out_specs=pl.BlockSpec((TB, TV), lambda i, j, idx: (i, j)),
        scratch_shapes=[pltpu.VMEM((TB, E_pad), jnp.float32),
                        pltpu.VMEM((TB, E_pad), jnp.bfloat16)],
    )

    kernel = functools.partial(cbow_kernel, tb=TB, ctx_len=C,
                               cache_mean=cache_mean)

    out_pad = pl.pallas_call(
        kernel,
        out_shape=jax.ShapeDtypeStruct((B_pad, V_pad), jnp.float32),
        grid_spec=grid_spec,
        compiler_params=pltpu.CompilerParams(
            dimension_semantics=dims,
            vmem_limit_bytes=vmem_limit),
    )(idx_flat, emb_p, w_p, b_p)

    return out_pad[:B, :V]


def cbow_reference(indices, emb_table, weight, bias):
    emb = jnp.take(emb_table, indices, axis=0)                  # (B, C, E)
    mean_emb = emb.mean(axis=1)                                 # (B, E)
    return mean_emb @ weight.T + bias                           # (B, V)


if __name__ == "__main__":
    # Small, deterministic synthetic setup (exercises batch & vocab padding).
    voc, emb_dim = 200, 32
    batch, ctx = 5, 6

    key = jax.random.PRNGKey(0)
    k_emb, k_w, k_b, k_idx = jax.random.split(key, 4)

    emb_table = jax.random.normal(k_emb, (voc, emb_dim), dtype=jnp.float32)
    weight = jax.random.normal(k_w, (voc, emb_dim), dtype=jnp.float32) * 0.1
    bias = jax.random.normal(k_b, (voc,), dtype=jnp.float32) * 0.01
    indices = jax.random.randint(k_idx, (batch, ctx), 0, voc, dtype=jnp.int32)

    out = cbow_forward(indices, emb_table, weight, bias)
    out = jax.block_until_ready(out)

    ref = cbow_reference(indices, emb_table, weight, bias)
    assert out.shape == (batch, voc)
    # bf16 MXU operands -> loosened tolerance vs the f32 reference.
    assert jnp.allclose(out, ref, atol=2e-2, rtol=2e-2), "mismatch vs reference"

    print("KERNEL_OK")
</pallas_src>

<mosaic_0001>
module attributes {stable_mosaic.version = 11 : i64} {
  func.func @cbow_kernel(%arg0: i32, %arg1: i32, %arg2: memref<48xi32, #tpu.memory_space<smem>>, %arg3: memref<200x128xf32, #tpu.memory_space<vmem>>, %arg4: memref<256x128xbf16, #tpu.memory_space<vmem>>, %arg5: memref<1x256xf32, #tpu.memory_space<vmem>>, %arg6: memref<8x256xf32, #tpu.memory_space<vmem>>, %arg7: memref<8x128xf32, #tpu.memory_space<vmem>>, %arg8: memref<8x128xbf16, #tpu.memory_space<vmem>>) attributes {dimension_semantics = [#tpu.dimension_semantics<parallel>, #tpu.dimension_semantics<parallel>], iteration_bounds = array<i64: 1, 1>, scalar_prefetch = 1 : i64, scratch_operands = 2 : i64, tpu.core_type = #tpu.core_type<tc>, window_params = [{pipeline_mode = #tpu.pipeline_mode<synchronous>, transform_indices = @transform_0, window_bounds = array<i64: 200, 128>}, {transform_indices = @transform_1, window_bounds = array<i64: 256, 128>}, {transform_indices = @transform_2, window_bounds = array<i64: 1, 256>}, {transform_indices = @transform_3, window_bounds = array<i64: 8, 256>}]} {
    %c8_i32 = arith.constant 8 : i32
    %0 = arith.muli %arg0, %c8_i32 : i32
    %cst = arith.constant 0.166666672 : f32
    %c0_i32 = arith.constant 0 : i32
    %c8_i32_0 = arith.constant 8 : i32
    %1 = arith.muli %c0_i32, %c8_i32_0 : i32
    %2 = arith.addi %0, %1 : i32
    %cst_1 = arith.constant 0.000000e+00 : f32
    %3 = vector.broadcast %cst_1 : f32 to vector<1x128xf32>
    %c0_i32_2 = arith.constant 0 : i32
    %4 = arith.addi %2, %c0_i32_2 : i32
    %c6_i32 = arith.constant 6 : i32
    %5 = arith.muli %4, %c6_i32 : i32
    %c0_i32_3 = arith.constant 0 : i32
    %6 = arith.addi %5, %c0_i32_3 : i32
    %7 = arith.index_cast %6 : i32 to index
    %8 = memref.load %arg2[%7] : memref<48xi32, #tpu.memory_space<smem>>
    %9 = arith.index_cast %8 : i32 to index
    %c0 = arith.constant 0 : index
    %10 = vector.load %arg3[%9, %c0] : memref<200x128xf32, #tpu.memory_space<vmem>>, vector<1x128xf32>
    %11 = arith.addf %3, %10 : vector<1x128xf32>
    %c0_i32_4 = arith.constant 0 : i32
    %12 = arith.addi %2, %c0_i32_4 : i32
    %c6_i32_5 = arith.constant 6 : i32
    %13 = arith.muli %12, %c6_i32_5 : i32
    %c1_i32 = arith.constant 1 : i32
    %14 = arith.addi %13, %c1_i32 : i32
    %15 = arith.index_cast %14 : i32 to index
    %16 = memref.load %arg2[%15] : memref<48xi32, #tpu.memory_space<smem>>
    %17 = arith.index_cast %16 : i32 to index
    %c0_6 = arith.constant 0 : index
    %18 = vector.load %arg3[%17, %c0_6] : memref<200x128xf32, #tpu.memory_space<vmem>>, vector<1x128xf32>
    %19 = arith.addf %11, %18 : vector<1x128xf32>
    %c0_i32_7 = arith.constant 0 : i32
    %20 = arith.addi %2, %c0_i32_7 : i32
    %c6_i32_8 = arith.constant 6 : i32
    %21 = arith.muli %20, %c6_i32_8 : i32
    %c2_i32 = arith.constant 2 : i32
    %22 = arith.addi %21, %c2_i32 : i32
    %23 = arith.index_cast %22 : i32 to index
    %24 = memref.load %arg2[%23] : memref<48xi32, #tpu.memory_space<smem>>
    %25 = arith.index_cast %24 : i32 to index
    %c0_9 = arith.constant 0 : index
    %26 = vector.load %arg3[%25, %c0_9] : memref<200x128xf32, #tpu.memory_space<vmem>>, vector<1x128xf32>
    %27 = arith.addf %19, %26 : vector<1x128xf32>
    %c0_i32_10 = arith.constant 0 : i32
    %28 = arith.addi %2, %c0_i32_10 : i32
    %c6_i32_11 = arith.constant 6 : i32
    %29 = arith.muli %28, %c6_i32_11 : i32
    %c3_i32 = arith.constant 3 : i32
    %30 = arith.addi %29, %c3_i32 : i32
    %31 = arith.index_cast %30 : i32 to index
    %32 = memref.load %arg2[%31] : memref<48xi32, #tpu.memory_space<smem>>
    %33 = arith.index_cast %32 : i32 to index
    %c0_12 = arith.constant 0 : index
    %34 = vector.load %arg3[%33, %c0_12] : memref<200x128xf32, #tpu.memory_space<vmem>>, vector<1x128xf32>
    %35 = arith.addf %27, %34 : vector<1x128xf32>
    %c0_i32_13 = arith.constant 0 : i32
    %36 = arith.addi %2, %c0_i32_13 : i32
    %c6_i32_14 = arith.constant 6 : i32
    %37 = arith.muli %36, %c6_i32_14 : i32
    %c4_i32 = arith.constant 4 : i32
    %38 = arith.addi %37, %c4_i32 : i32
    %39 = arith.index_cast %38 : i32 to index
    %40 = memref.load %arg2[%39] : memref<48xi32, #tpu.memory_space<smem>>
    %41 = arith.index_cast %40 : i32 to index
    %c0_15 = arith.constant 0 : index
    %42 = vector.load %arg3[%41, %c0_15] : memref<200x128xf32, #tpu.memory_space<vmem>>, vector<1x128xf32>
    %43 = arith.addf %35, %42 : vector<1x128xf32>
    %c0_i32_16 = arith.constant 0 : i32
    %44 = arith.addi %2, %c0_i32_16 : i32
    %c6_i32_17 = arith.constant 6 : i32
    %45 = arith.muli %44, %c6_i32_17 : i32
    %c5_i32 = arith.constant 5 : i32
    %46 = arith.addi %45, %c5_i32 : i32
    %47 = arith.index_cast %46 : i32 to index
    %48 = memref.load %arg2[%47] : memref<48xi32, #tpu.memory_space<smem>>
    %49 = arith.index_cast %48 : i32 to index
    %c0_18 = arith.constant 0 : index
    %50 = vector.load %arg3[%49, %c0_18] : memref<200x128xf32, #tpu.memory_space<vmem>>, vector<1x128xf32>
    %51 = arith.addf %43, %50 : vector<1x128xf32>
    %cst_19 = arith.constant 0.000000e+00 : f32
    %52 = vector.broadcast %cst_19 : f32 to vector<1x128xf32>
    %c1_i32_20 = arith.constant 1 : i32
    %53 = arith.addi %2, %c1_i32_20 : i32
    %c6_i32_21 = arith.constant 6 : i32
    %54 = arith.muli %53, %c6_i32_21 : i32
    %c0_i32_22 = arith.constant 0 : i32
    %55 = arith.addi %54, %c0_i32_22 : i32
    %56 = arith.index_cast %55 : i32 to index
    %57 = memref.load %arg2[%56] : memref<48xi32, #tpu.memory_space<smem>>
    %58 = arith.index_cast %57 : i32 to index
    %c0_23 = arith.constant 0 : index
    %59 = vector.load %arg3[%58, %c0_23] : memref<200x128xf32, #tpu.memory_space<vmem>>, vector<1x128xf32>
    %60 = arith.addf %52, %59 : vector<1x128xf32>
    %c1_i32_24 = arith.constant 1 : i32
    %61 = arith.addi %2, %c1_i32_24 : i32
    %c6_i32_25 = arith.constant 6 : i32
    %62 = arith.muli %61, %c6_i32_25 : i32
    %c1_i32_26 = arith.constant 1 : i32
    %63 = arith.addi %62, %c1_i32_26 : i32
    %64 = arith.index_cast %63 : i32 to index
    %65 = memref.load %arg2[%64] : memref<48xi32, #tpu.memory_space<smem>>
    %66 = arith.index_cast %65 : i32 to index
    %c0_27 = arith.constant 0 : index
    %67 = vector.load %arg3[%66, %c0_27] : memref<200x128xf32, #tpu.memory_space<vmem>>, vector<1x128xf32>
    %68 = arith.addf %60, %67 : vector<1x128xf32>
    %c1_i32_28 = arith.constant 1 : i32
    %69 = arith.addi %2, %c1_i32_28 : i32
    %c6_i32_29 = arith.constant 6 : i32
    %70 = arith.muli %69, %c6_i32_29 : i32
    %c2_i32_30 = arith.constant 2 : i32
    %71 = arith.addi %70, %c2_i32_30 : i32
    %72 = arith.index_cast %71 : i32 to index
    %73 = memref.load %arg2[%72] : memref<48xi32, #tpu.memory_space<smem>>
    %74 = arith.index_cast %73 : i32 to index
    %c0_31 = arith.constant 0 : index
    %75 = vector.load %arg3[%74, %c0_31] : memref<200x128xf32, #tpu.memory_space<vmem>>, vector<1x128xf32>
    %76 = arith.addf %68, %75 : vector<1x128xf32>
    %c1_i32_32 = arith.constant 1 : i32
    %77 = arith.addi %2, %c1_i32_32 : i32
    %c6_i32_33 = arith.constant 6 : i32
    %78 = arith.muli %77, %c6_i32_33 : i32
    %c3_i32_34 = arith.constant 3 : i32
    %79 = arith.addi %78, %c3_i32_34 : i32
    %80 = arith.index_cast %79 : i32 to index
    %81 = memref.load %arg2[%80] : memref<48xi32, #tpu.memory_space<smem>>
    %82 = arith.index_cast %81 : i32 to index
    %c0_35 = arith.constant 0 : index
    %83 = vector.load %arg3[%82, %c0_35] : memref<200x128xf32, #tpu.memory_space<vmem>>, vector<1x128xf32>
    %84 = arith.addf %76, %83 : vector<1x128xf32>
    %c1_i32_36 = arith.constant 1 : i32
    %85 = arith.addi %2, %c1_i32_36 : i32
    %c6_i32_37 = arith.constant 6 : i32
    %86 = arith.muli %85, %c6_i32_37 : i32
    %c4_i32_38 = arith.constant 4 : i32
    %87 = arith.addi %86, %c4_i32_38 : i32
    %88 = arith.index_cast %87 : i32 to index
    %89 = memref.load %arg2[%88] : memref<48xi32, #tpu.memory_space<smem>>
    %90 = arith.index_cast %89 : i32 to index
    %c0_39 = arith.constant 0 : index
    %91 = vector.load %arg3[%90, %c0_39] : memref<200x128xf32, #tpu.memory_space<vmem>>, vector<1x128xf32>
    %92 = arith.addf %84, %91 : vector<1x128xf32>
    %c1_i32_40 = arith.constant 1 : i32
    %93 = arith.addi %2, %c1_i32_40 : i32
    %c6_i32_41 = arith.constant 6 : i32
    %94 = arith.muli %93, %c6_i32_41 : i32
    %c5_i32_42 = arith.constant 5 : i32
    %95 = arith.addi %94, %c5_i32_42 : i32
    %96 = arith.index_cast %95 : i32 to index
    %97 = memref.load %arg2[%96] : memref<48xi32, #tpu.memory_space<smem>>
    %98 = arith.index_cast %97 : i32 to index
    %c0_43 = arith.constant 0 : index
    %99 = vector.load %arg3[%98, %c0_43] : memref<200x128xf32, #tpu.memory_space<vmem>>, vector<1x128xf32>
    %100 = arith.addf %92, %99 : vector<1x128xf32>
    %cst_44 = arith.constant 0.000000e+00 : f32
    %101 = vector.broadcast %cst_44 : f32 to vector<1x128xf32>
    %c2_i32_45 = arith.constant 2 : i32
    %102 = arith.addi %2, %c2_i32_45 : i32
    %c6_i32_46 = arith.constant 6 : i32
    %103 = arith.muli %102, %c6_i32_46 : i32
    %c0_i32_47 = arith.constant 0 : i32
    %104 = arith.addi %103, %c0_i32_47 : i32
    %105 = arith.index_cast %104 : i32 to index
    %106 = memref.load %arg2[%105] : memref<48xi32, #tpu.memory_space<smem>>
    %107 = arith.index_cast %106 : i32 to index
    %c0_48 = arith.constant 0 : index
    %108 = vector.load %arg3[%107, %c0_48] : memref<200x128xf32, #tpu.memory_space<vmem>>, vector<1x128xf32>
    %109 = arith.addf %101, %108 : vector<1x128xf32>
    %c2_i32_49 = arith.constant 2 : i32
    %110 = arith.addi %2, %c2_i32_49 : i32
    %c6_i32_50 = arith.constant 6 : i32
    %111 = arith.muli %110, %c6_i32_50 : i32
    %c1_i32_51 = arith.constant 1 : i32
    %112 = arith.addi %111, %c1_i32_51 : i32
    %113 = arith.index_cast %112 : i32 to index
    %114 = memref.load %arg2[%113] : memref<48xi32, #tpu.memory_space<smem>>
    %115 = arith.index_cast %114 : i32 to index
    %c0_52 = arith.constant 0 : index
    %116 = vector.load %arg3[%115, %c0_52] : memref<200x128xf32, #tpu.memory_space<vmem>>, vector<1x128xf32>
    %117 = arith.addf %109, %116 : vector<1x128xf32>
    %c2_i32_53 = arith.constant 2 : i32
    %118 = arith.addi %2, %c2_i32_53 : i32
    %c6_i32_54 = arith.constant 6 : i32
    %119 = arith.muli %118, %c6_i32_54 : i32
    %c2_i32_55 = arith.constant 2 : i32
    %120 = arith.addi %119, %c2_i32_55 : i32
    %121 = arith.index_cast %120 : i32 to index
    %122 = memref.load %arg2[%121] : memref<48xi32, #tpu.memory_space<smem>>
    %123 = arith.index_cast %122 : i32 to index
    %c0_56 = arith.constant 0 : index
    %124 = vector.load %arg3[%123, %c0_56] : memref<200x128xf32, #tpu.memory_space<vmem>>, vector<1x128xf32>
    %125 = arith.addf %117, %124 : vector<1x128xf32>
    %c2_i32_57 = arith.constant 2 : i32
    %126 = arith.addi %2, %c2_i32_57 : i32
    %c6_i32_58 = arith.constant 6 : i32
    %127 = arith.muli %126, %c6_i32_58 : i32
    %c3_i32_59 = arith.constant 3 : i32
    %128 = arith.addi %127, %c3_i32_59 : i32
    %129 = arith.index_cast %128 : i32 to index
    %130 = memref.load %arg2[%129] : memref<48xi32, #tpu.memory_space<smem>>
    %131 = arith.index_cast %130 : i32 to index
    %c0_60 = arith.constant 0 : index
    %132 = vector.load %arg3[%131, %c0_60] : memref<200x128xf32, #tpu.memory_space<vmem>>, vector<1x128xf32>
    %133 = arith.addf %125, %132 : vector<1x128xf32>
    %c2_i32_61 = arith.constant 2 : i32
    %134 = arith.addi %2, %c2_i32_61 : i32
    %c6_i32_62 = arith.constant 6 : i32
    %135 = arith.muli %134, %c6_i32_62 : i32
    %c4_i32_63 = arith.constant 4 : i32
    %136 = arith.addi %135, %c4_i32_63 : i32
    %137 = arith.index_cast %136 : i32 to index
    %138 = memref.load %arg2[%137] : memref<48xi32, #tpu.memory_space<smem>>
    %139 = arith.index_cast %138 : i32 to index
    %c0_64 = arith.constant 0 : index
    %140 = vector.load %arg3[%139, %c0_64] : memref<200x128xf32, #tpu.memory_space<vmem>>, vector<1x128xf32>
    %141 = arith.addf %133, %140 : vector<1x128xf32>
    %c2_i32_65 = arith.constant 2 : i32
    %142 = arith.addi %2, %c2_i32_65 : i32
    %c6_i32_66 = arith.constant 6 : i32
    %143 = arith.muli %142, %c6_i32_66 : i32
    %c5_i32_67 = arith.constant 5 : i32
    %144 = arith.addi %143, %c5_i32_67 : i32
    %145 = arith.index_cast %144 : i32 to index
    %146 = memref.load %arg2[%145] : memref<48xi32, #tpu.memory_space<smem>>
    %147 = arith.index_cast %146 : i32 to index
    %c0_68 = arith.constant 0 : index
    %148 = vector.load %arg3[%147, %c0_68] : memref<200x128xf32, #tpu.memory_space<vmem>>, vector<1x128xf32>
    %149 = arith.addf %141, %148 : vector<1x128xf32>
    %cst_69 = arith.constant 0.000000e+00 : f32
    %150 = vector.broadcast %cst_69 : f32 to vector<1x128xf32>
    %c3_i32_70 = arith.constant 3 : i32
    %151 = arith.addi %2, %c3_i32_70 : i32
    %c6_i32_71 = arith.constant 6 : i32
    %152 = arith.muli %151, %c6_i32_71 : i32
    %c0_i32_72 = arith.constant 0 : i32
    %153 = arith.addi %152, %c0_i32_72 : i32
    %154 = arith.index_cast %153 : i32 to index
    %155 = memref.load %arg2[%154] : memref<48xi32, #tpu.memory_space<smem>>
    %156 = arith.index_cast %155 : i32 to index
    %c0_73 = arith.constant 0 : index
    %157 = vector.load %arg3[%156, %c0_73] : memref<200x128xf32, #tpu.memory_space<vmem>>, vector<1x128xf32>
    %158 = arith.addf %150, %157 : vector<1x128xf32>
    %c3_i32_74 = arith.constant 3 : i32
    %159 = arith.addi %2, %c3_i32_74 : i32
    %c6_i32_75 = arith.constant 6 : i32
    %160 = arith.muli %159, %c6_i32_75 : i32
    %c1_i32_76 = arith.constant 1 : i32
    %161 = arith.addi %160, %c1_i32_76 : i32
    %162 = arith.index_cast %161 : i32 to index
    %163 = memref.load %arg2[%162] : memref<48xi32, #tpu.memory_space<smem>>
    %164 = arith.index_cast %163 : i32 to index
    %c0_77 = arith.constant 0 : index
    %165 = vector.load %arg3[%164, %c0_77] : memref<200x128xf32, #tpu.memory_space<vmem>>, vector<1x128xf32>
    %166 = arith.addf %158, %165 : vector<1x128xf32>
    %c3_i32_78 = arith.constant 3 : i32
    %167 = arith.addi %2, %c3_i32_78 : i32
    %c6_i32_79 = arith.constant 6 : i32
    %168 = arith.muli %167, %c6_i32_79 : i32
    %c2_i32_80 = arith.constant 2 : i32
    %169 = arith.addi %168, %c2_i32_80 : i32
    %170 = arith.index_cast %169 : i32 to index
    %171 = memref.load %arg2[%170] : memref<48xi32, #tpu.memory_space<smem>>
    %172 = arith.index_cast %171 : i32 to index
    %c0_81 = arith.constant 0 : index
    %173 = vector.load %arg3[%172, %c0_81] : memref<200x128xf32, #tpu.memory_space<vmem>>, vector<1x128xf32>
    %174 = arith.addf %166, %173 : vector<1x128xf32>
    %c3_i32_82 = arith.constant 3 : i32
    %175 = arith.addi %2, %c3_i32_82 : i32
    %c6_i32_83 = arith.constant 6 : i32
    %176 = arith.muli %175, %c6_i32_83 : i32
    %c3_i32_84 = arith.constant 3 : i32
    %177 = arith.addi %176, %c3_i32_84 : i32
    %178 = arith.index_cast %177 : i32 to index
    %179 = memref.load %arg2[%178] : memref<48xi32, #tpu.memory_space<smem>>
    %180 = arith.index_cast %179 : i32 to index
    %c0_85 = arith.constant 0 : index
    %181 = vector.load %arg3[%180, %c0_85] : memref<200x128xf32, #tpu.memory_space<vmem>>, vector<1x128xf32>
    %182 = arith.addf %174, %181 : vector<1x128xf32>
    %c3_i32_86 = arith.constant 3 : i32
    %183 = arith.addi %2, %c3_i32_86 : i32
    %c6_i32_87 = arith.constant 6 : i32
    %184 = arith.muli %183, %c6_i32_87 : i32
    %c4_i32_88 = arith.constant 4 : i32
    %185 = arith.addi %184, %c4_i32_88 : i32
    %186 = arith.index_cast %185 : i32 to index
    %187 = memref.load %arg2[%186] : memref<48xi32, #tpu.memory_space<smem>>
    %188 = arith.index_cast %187 : i32 to index
    %c0_89 = arith.constant 0 : index
    %189 = vector.load %arg3[%188, %c0_89] : memref<200x128xf32, #tpu.memory_space<vmem>>, vector<1x128xf32>
    %190 = arith.addf %182, %189 : vector<1x128xf32>
    %c3_i32_90 = arith.constant 3 : i32
    %191 = arith.addi %2, %c3_i32_90 : i32
    %c6_i32_91 = arith.constant 6 : i32
    %192 = arith.muli %191, %c6_i32_91 : i32
    %c5_i32_92 = arith.constant 5 : i32
    %193 = arith.addi %192, %c5_i32_92 : i32
    %194 = arith.index_cast %193 : i32 to index
    %195 = memref.load %arg2[%194] : memref<48xi32, #tpu.memory_space<smem>>
    %196 = arith.index_cast %195 : i32 to index
    %c0_93 = arith.constant 0 : index
    %197 = vector.load %arg3[%196, %c0_93] : memref<200x128xf32, #tpu.memory_space<vmem>>, vector<1x128xf32>
    %198 = arith.addf %190, %197 : vector<1x128xf32>
    %cst_94 = arith.constant 0.000000e+00 : f32
    %199 = vector.broadcast %cst_94 : f32 to vector<1x128xf32>
    %c4_i32_95 = arith.constant 4 : i32
    %200 = arith.addi %2, %c4_i32_95 : i32
    %c6_i32_96 = arith.constant 6 : i32
    %201 = arith.muli %200, %c6_i32_96 : i32
    %c0_i32_97 = arith.constant 0 : i32
    %202 = arith.addi %201, %c0_i32_97 : i32
    %203 = arith.index_cast %202 : i32 to index
    %204 = memref.load %arg2[%203] : memref<48xi32, #tpu.memory_space<smem>>
    %205 = arith.index_cast %204 : i32 to index
    %c0_98 = arith.constant 0 : index
    %206 = vector.load %arg3[%205, %c0_98] : memref<200x128xf32, #tpu.memory_space<vmem>>, vector<1x128xf32>
    %207 = arith.addf %199, %206 : vector<1x128xf32>
    %c4_i32_99 = arith.constant 4 : i32
    %208 = arith.addi %2, %c4_i32_99 : i32
    %c6_i32_100 = arith.constant 6 : i32
    %209 = arith.muli %208, %c6_i32_100 : i32
    %c1_i32_101 = arith.constant 1 : i32
    %210 = arith.addi %209, %c1_i32_101 : i32
    %211 = arith.index_cast %210 : i32 to index
    %212 = memref.load %arg2[%211] : memref<48xi32, #tpu.memory_space<smem>>
    %213 = arith.index_cast %212 : i32 to index
    %c0_102 = arith.constant 0 : index
    %214 = vector.load %arg3[%213, %c0_102] : memref<200x128xf32, #tpu.memory_space<vmem>>, vector<1x128xf32>
    %215 = arith.addf %207, %214 : vector<1x128xf32>
    %c4_i32_103 = arith.constant 4 : i32
    %216 = arith.addi %2, %c4_i32_103 : i32
    %c6_i32_104 = arith.constant 6 : i32
    %217 = arith.muli %216, %c6_i32_104 : i32
    %c2_i32_105 = arith.constant 2 : i32
    %218 = arith.addi %217, %c2_i32_105 : i32
    %219 = arith.index_cast %218 : i32 to index
    %220 = memref.load %arg2[%219] : memref<48xi32, #tpu.memory_space<smem>>
    %221 = arith.index_cast %220 : i32 to index
    %c0_106 = arith.constant 0 : index
    %222 = vector.load %arg3[%221, %c0_106] : memref<200x128xf32, #tpu.memory_space<vmem>>, vector<1x128xf32>
    %223 = arith.addf %215, %222 : vector<1x128xf32>
    %c4_i32_107 = arith.constant 4 : i32
    %224 = arith.addi %2, %c4_i32_107 : i32
    %c6_i32_108 = arith.constant 6 : i32
    %225 = arith.muli %224, %c6_i32_108 : i32
    %c3_i32_109 = arith.constant 3 : i32
    %226 = arith.addi %225, %c3_i32_109 : i32
    %227 = arith.index_cast %226 : i32 to index
    %228 = memref.load %arg2[%227] : memref<48xi32, #tpu.memory_space<smem>>
    %229 = arith.index_cast %228 : i32 to index
    %c0_110 = arith.constant 0 : index
    %230 = vector.load %arg3[%229, %c0_110] : memref<200x128xf32, #tpu.memory_space<vmem>>, vector<1x128xf32>
    %231 = arith.addf %223, %230 : vector<1x128xf32>
    %c4_i32_111 = arith.constant 4 : i32
    %232 = arith.addi %2, %c4_i32_111 : i32
    %c6_i32_112 = arith.constant 6 : i32
    %233 = arith.muli %232, %c6_i32_112 : i32
    %c4_i32_113 = arith.constant 4 : i32
    %234 = arith.addi %233, %c4_i32_113 : i32
    %235 = arith.index_cast %234 : i32 to index
    %236 = memref.load %arg2[%235] : memref<48xi32, #tpu.memory_space<smem>>
    %237 = arith.index_cast %236 : i32 to index
    %c0_114 = arith.constant 0 : index
    %238 = vector.load %arg3[%237, %c0_114] : memref<200x128xf32, #tpu.memory_space<vmem>>, vector<1x128xf32>
    %239 = arith.addf %231, %238 : vector<1x128xf32>
    %c4_i32_115 = arith.constant 4 : i32
    %240 = arith.addi %2, %c4_i32_115 : i32
    %c6_i32_116 = arith.constant 6 : i32
    %241 = arith.muli %240, %c6_i32_116 : i32
    %c5_i32_117 = arith.constant 5 : i32
    %242 = arith.addi %241, %c5_i32_117 : i32
    %243 = arith.index_cast %242 : i32 to index
    %244 = memref.load %arg2[%243] : memref<48xi32, #tpu.memory_space<smem>>
    %245 = arith.index_cast %244 : i32 to index
    %c0_118 = arith.constant 0 : index
    %246 = vector.load %arg3[%245, %c0_118] : memref<200x128xf32, #tpu.memory_space<vmem>>, vector<1x128xf32>
    %247 = arith.addf %239, %246 : vector<1x128xf32>
    %cst_119 = arith.constant 0.000000e+00 : f32
    %248 = vector.broadcast %cst_119 : f32 to vector<1x128xf32>
    %c5_i32_120 = arith.constant 5 : i32
    %249 = arith.addi %2, %c5_i32_120 : i32
    %c6_i32_121 = arith.constant 6 : i32
    %250 = arith.muli %249, %c6_i32_121 : i32
    %c0_i32_122 = arith.constant 0 : i32
    %251 = arith.addi %250, %c0_i32_122 : i32
    %252 = arith.index_cast %251 : i32 to index
    %253 = memref.load %arg2[%252] : memref<48xi32, #tpu.memory_space<smem>>
    %254 = arith.index_cast %253 : i32 to index
    %c0_123 = arith.constant 0 : index
    %255 = vector.load %arg3[%254, %c0_123] : memref<200x128xf32, #tpu.memory_space<vmem>>, vector<1x128xf32>
    %256 = arith.addf %248, %255 : vector<1x128xf32>
    %c5_i32_124 = arith.constant 5 : i32
    %257 = arith.addi %2, %c5_i32_124 : i32
    %c6_i32_125 = arith.constant 6 : i32
    %258 = arith.muli %257, %c6_i32_125 : i32
    %c1_i32_126 = arith.constant 1 : i32
    %259 = arith.addi %258, %c1_i32_126 : i32
    %260 = arith.index_cast %259 : i32 to index
    %261 = memref.load %arg2[%260] : memref<48xi32, #tpu.memory_space<smem>>
    %262 = arith.index_cast %261 : i32 to index
    %c0_127 = arith.constant 0 : index
    %263 = vector.load %arg3[%262, %c0_127] : memref<200x128xf32, #tpu.memory_space<vmem>>, vector<1x128xf32>
    %264 = arith.addf %256, %263 : vector<1x128xf32>
    %c5_i32_128 = arith.constant 5 : i32
    %265 = arith.addi %2, %c5_i32_128 : i32
    %c6_i32_129 = arith.constant 6 : i32
    %266 = arith.muli %265, %c6_i32_129 : i32
    %c2_i32_130 = arith.constant 2 : i32
    %267 = arith.addi %266, %c2_i32_130 : i32
    %268 = arith.index_cast %267 : i32 to index
    %269 = memref.load %arg2[%268] : memref<48xi32, #tpu.memory_space<smem>>
    %270 = arith.index_cast %269 : i32 to index
    %c0_131 = arith.constant 0 : index
    %271 = vector.load %arg3[%270, %c0_131] : memref<200x128xf32, #tpu.memory_space<vmem>>, vector<1x128xf32>
    %272 = arith.addf %264, %271 : vector<1x128xf32>
    %c5_i32_132 = arith.constant 5 : i32
    %273 = arith.addi %2, %c5_i32_132 : i32
    %c6_i32_133 = arith.constant 6 : i32
    %274 = arith.muli %273, %c6_i32_133 : i32
    %c3_i32_134 = arith.constant 3 : i32
    %275 = arith.addi %274, %c3_i32_134 : i32
    %276 = arith.index_cast %275 : i32 to index
    %277 = memref.load %arg2[%276] : memref<48xi32, #tpu.memory_space<smem>>
    %278 = arith.index_cast %277 : i32 to index
    %c0_135 = arith.constant 0 : index
    %279 = vector.load %arg3[%278, %c0_135] : memref<200x128xf32, #tpu.memory_space<vmem>>, vector<1x128xf32>
    %280 = arith.addf %272, %279 : vector<1x128xf32>
    %c5_i32_136 = arith.constant 5 : i32
    %281 = arith.addi %2, %c5_i32_136 : i32
    %c6_i32_137 = arith.constant 6 : i32
    %282 = arith.muli %281, %c6_i32_137 : i32
    %c4_i32_138 = arith.constant 4 : i32
    %283 = arith.addi %282, %c4_i32_138 : i32
    %284 = arith.index_cast %283 : i32 to index
    %285 = memref.load %arg2[%284] : memref<48xi32, #tpu.memory_space<smem>>
    %286 = arith.index_cast %285 : i32 to index
    %c0_139 = arith.constant 0 : index
    %287 = vector.load %arg3[%286, %c0_139] : memref<200x128xf32, #tpu.memory_space<vmem>>, vector<1x128xf32>
    %288 = arith.addf %280, %287 : vector<1x128xf32>
    %c5_i32_140 = arith.constant 5 : i32
    %289 = arith.addi %2, %c5_i32_140 : i32
    %c6_i32_141 = arith.constant 6 : i32
    %290 = arith.muli %289, %c6_i32_141 : i32
    %c5_i32_142 = arith.constant 5 : i32
    %291 = arith.addi %290, %c5_i32_142 : i32
    %292 = arith.index_cast %291 : i32 to index
    %293 = memref.load %arg2[%292] : memref<48xi32, #tpu.memory_space<smem>>
    %294 = arith.index_cast %293 : i32 to index
    %c0_143 = arith.constant 0 : index
    %295 = vector.load %arg3[%294, %c0_143] : memref<200x128xf32, #tpu.memory_space<vmem>>, vector<1x128xf32>
    %296 = arith.addf %288, %295 : vector<1x128xf32>
    %cst_144 = arith.constant 0.000000e+00 : f32
    %297 = vector.broadcast %cst_144 : f32 to vector<1x128xf32>
    %c6_i32_145 = arith.constant 6 : i32
    %298 = arith.addi %2, %c6_i32_145 : i32
    %c6_i32_146 = arith.constant 6 : i32
    %299 = arith.muli %298, %c6_i32_146 : i32
    %c0_i32_147 = arith.constant 0 : i32
    %300 = arith.addi %299, %c0_i32_147 : i32
    %301 = arith.index_cast %300 : i32 to index
    %302 = memref.load %arg2[%301] : memref<48xi32, #tpu.memory_space<smem>>
    %303 = arith.index_cast %302 : i32 to index
    %c0_148 = arith.constant 0 : index
    %304 = vector.load %arg3[%303, %c0_148] : memref<200x128xf32, #tpu.memory_space<vmem>>, vector<1x128xf32>
    %305 = arith.addf %297, %304 : vector<1x128xf32>
    %c6_i32_149 = arith.constant 6 : i32
    %306 = arith.addi %2, %c6_i32_149 : i32
    %c6_i32_150 = arith.constant 6 : i32
    %307 = arith.muli %306, %c6_i32_150 : i32
    %c1_i32_151 = arith.constant 1 : i32
    %308 = arith.addi %307, %c1_i32_151 : i32
    %309 = arith.index_cast %308 : i32 to index
    %310 = memref.load %arg2[%309] : memref<48xi32, #tpu.memory_space<smem>>
    %311 = arith.index_cast %310 : i32 to index
    %c0_152 = arith.constant 0 : index
    %312 = vector.load %arg3[%311, %c0_152] : memref<200x128xf32, #tpu.memory_space<vmem>>, vector<1x128xf32>
    %313 = arith.addf %305, %312 : vector<1x128xf32>
    %c6_i32_153 = arith.constant 6 : i32
    %314 = arith.addi %2, %c6_i32_153 : i32
    %c6_i32_154 = arith.constant 6 : i32
    %315 = arith.muli %314, %c6_i32_154 : i32
    %c2_i32_155 = arith.constant 2 : i32
    %316 = arith.addi %315, %c2_i32_155 : i32
    %317 = arith.index_cast %316 : i32 to index
    %318 = memref.load %arg2[%317] : memref<48xi32, #tpu.memory_space<smem>>
    %319 = arith.index_cast %318 : i32 to index
    %c0_156 = arith.constant 0 : index
    %320 = vector.load %arg3[%319, %c0_156] : memref<200x128xf32, #tpu.memory_space<vmem>>, vector<1x128xf32>
    %321 = arith.addf %313, %320 : vector<1x128xf32>
    %c6_i32_157 = arith.constant 6 : i32
    %322 = arith.addi %2, %c6_i32_157 : i32
    %c6_i32_158 = arith.constant 6 : i32
    %323 = arith.muli %322, %c6_i32_158 : i32
    %c3_i32_159 = arith.constant 3 : i32
    %324 = arith.addi %323, %c3_i32_159 : i32
    %325 = arith.index_cast %324 : i32 to index
    %326 = memref.load %arg2[%325] : memref<48xi32, #tpu.memory_space<smem>>
    %327 = arith.index_cast %326 : i32 to index
    %c0_160 = arith.constant 0 : index
    %328 = vector.load %arg3[%327, %c0_160] : memref<200x128xf32, #tpu.memory_space<vmem>>, vector<1x128xf32>
    %329 = arith.addf %321, %328 : vector<1x128xf32>
    %c6_i32_161 = arith.constant 6 : i32
    %330 = arith.addi %2, %c6_i32_161 : i32
    %c6_i32_162 = arith.constant 6 : i32
    %331 = arith.muli %330, %c6_i32_162 : i32
    %c4_i32_163 = arith.constant 4 : i32
    %332 = arith.addi %331, %c4_i32_163 : i32
    %333 = arith.index_cast %332 : i32 to index
    %334 = memref.load %arg2[%333] : memref<48xi32, #tpu.memory_space<smem>>
    %335 = arith.index_cast %334 : i32 to index
    %c0_164 = arith.constant 0 : index
    %336 = vector.load %arg3[%335, %c0_164] : memref<200x128xf32, #tpu.memory_space<vmem>>, vector<1x128xf32>
    %337 = arith.addf %329, %336 : vector<1x128xf32>
    %c6_i32_165 = arith.constant 6 : i32
    %338 = arith.addi %2, %c6_i32_165 : i32
    %c6_i32_166 = arith.constant 6 : i32
    %339 = arith.muli %338, %c6_i32_166 : i32
    %c5_i32_167 = arith.constant 5 : i32
    %340 = arith.addi %339, %c5_i32_167 : i32
    %341 = arith.index_cast %340 : i32 to index
    %342 = memref.load %arg2[%341] : memref<48xi32, #tpu.memory_space<smem>>
    %343 = arith.index_cast %342 : i32 to index
    %c0_168 = arith.constant 0 : index
    %344 = vector.load %arg3[%343, %c0_168] : memref<200x128xf32, #tpu.memory_space<vmem>>, vector<1x128xf32>
    %345 = arith.addf %337, %344 : vector<1x128xf32>
    %cst_169 = arith.constant 0.000000e+00 : f32
    %346 = vector.broadcast %cst_169 : f32 to vector<1x128xf32>
    %c7_i32 = arith.constant 7 : i32
    %347 = arith.addi %2, %c7_i32 : i32
    %c6_i32_170 = arith.constant 6 : i32
    %348 = arith.muli %347, %c6_i32_170 : i32
    %c0_i32_171 = arith.constant 0 : i32
    %349 = arith.addi %348, %c0_i32_171 : i32
    %350 = arith.index_cast %349 : i32 to index
    %351 = memref.load %arg2[%350] : memref<48xi32, #tpu.memory_space<smem>>
    %352 = arith.index_cast %351 : i32 to index
    %c0_172 = arith.constant 0 : index
    %353 = vector.load %arg3[%352, %c0_172] : memref<200x128xf32, #tpu.memory_space<vmem>>, vector<1x128xf32>
    %354 = arith.addf %346, %353 : vector<1x128xf32>
    %c7_i32_173 = arith.constant 7 : i32
    %355 = arith.addi %2, %c7_i32_173 : i32
    %c6_i32_174 = arith.constant 6 : i32
    %356 = arith.muli %355, %c6_i32_174 : i32
    %c1_i32_175 = arith.constant 1 : i32
    %357 = arith.addi %356, %c1_i32_175 : i32
    %358 = arith.index_cast %357 : i32 to index
    %359 = memref.load %arg2[%358] : memref<48xi32, #tpu.memory_space<smem>>
    %360 = arith.index_cast %359 : i32 to index
    %c0_176 = arith.constant 0 : index
    %361 = vector.load %arg3[%360, %c0_176] : memref<200x128xf32, #tpu.memory_space<vmem>>, vector<1x128xf32>
    %362 = arith.addf %354, %361 : vector<1x128xf32>
    %c7_i32_177 = arith.constant 7 : i32
    %363 = arith.addi %2, %c7_i32_177 : i32
    %c6_i32_178 = arith.constant 6 : i32
    %364 = arith.muli %363, %c6_i32_178 : i32
    %c2_i32_179 = arith.constant 2 : i32
    %365 = arith.addi %364, %c2_i32_179 : i32
    %366 = arith.index_cast %365 : i32 to index
    %367 = memref.load %arg2[%366] : memref<48xi32, #tpu.memory_space<smem>>
    %368 = arith.index_cast %367 : i32 to index
    %c0_180 = arith.constant 0 : index
    %369 = vector.load %arg3[%368, %c0_180] : memref<200x128xf32, #tpu.memory_space<vmem>>, vector<1x128xf32>
    %370 = arith.addf %362, %369 : vector<1x128xf32>
    %c7_i32_181 = arith.constant 7 : i32
    %371 = arith.addi %2, %c7_i32_181 : i32
    %c6_i32_182 = arith.constant 6 : i32
    %372 = arith.muli %371, %c6_i32_182 : i32
    %c3_i32_183 = arith.constant 3 : i32
    %373 = arith.addi %372, %c3_i32_183 : i32
    %374 = arith.index_cast %373 : i32 to index
    %375 = memref.load %arg2[%374] : memref<48xi32, #tpu.memory_space<smem>>
    %376 = arith.index_cast %375 : i32 to index
    %c0_184 = arith.constant 0 : index
    %377 = vector.load %arg3[%376, %c0_184] : memref<200x128xf32, #tpu.memory_space<vmem>>, vector<1x128xf32>
    %378 = arith.addf %370, %377 : vector<1x128xf32>
    %c7_i32_185 = arith.constant 7 : i32
    %379 = arith.addi %2, %c7_i32_185 : i32
    %c6_i32_186 = arith.constant 6 : i32
    %380 = arith.muli %379, %c6_i32_186 : i32
    %c4_i32_187 = arith.constant 4 : i32
    %381 = arith.addi %380, %c4_i32_187 : i32
    %382 = arith.index_cast %381 : i32 to index
    %383 = memref.load %arg2[%382] : memref<48xi32, #tpu.memory_space<smem>>
    %384 = arith.index_cast %383 : i32 to index
    %c0_188 = arith.constant 0 : index
    %385 = vector.load %arg3[%384, %c0_188] : memref<200x128xf32, #tpu.memory_space<vmem>>, vector<1x128xf32>
    %386 = arith.addf %378, %385 : vector<1x128xf32>
    %c7_i32_189 = arith.constant 7 : i32
    %387 = arith.addi %2, %c7_i32_189 : i32
    %c6_i32_190 = arith.constant 6 : i32
    %388 = arith.muli %387, %c6_i32_190 : i32
    %c5_i32_191 = arith.constant 5 : i32
    %389 = arith.addi %388, %c5_i32_191 : i32
    %390 = arith.index_cast %389 : i32 to index
    %391 = memref.load %arg2[%390] : memref<48xi32, #tpu.memory_space<smem>>
    %392 = arith.index_cast %391 : i32 to index
    %c0_192 = arith.constant 0 : index
    %393 = vector.load %arg3[%392, %c0_192] : memref<200x128xf32, #tpu.memory_space<vmem>>, vector<1x128xf32>
    %394 = arith.addf %386, %393 : vector<1x128xf32>
    %395 = tpu.concatenate %51, %100, %149, %198, %247, %296, %345, %394 in 0 : vector<1x128xf32>, vector<1x128xf32>, vector<1x128xf32>, vector<1x128xf32>, vector<1x128xf32>, vector<1x128xf32>, vector<1x128xf32>, vector<1x128xf32> -> vector<8x128xf32>
    %396 = vector.broadcast %cst : f32 to vector<8x128xf32>
    %397 = arith.mulf %395, %396 : vector<8x128xf32>
    %c8_i32_193 = arith.constant 8 : i32
    %398 = arith.muli %c0_i32, %c8_i32_193 : i32
    %399 = arith.index_cast %398 : i32 to index
    %c0_194 = arith.constant 0 : index
    %400 = vector.load %arg7[%399, %c0_194] : memref<8x128xf32, #tpu.memory_space<vmem>>, vector<8x128xf32>
    tpu.vector_store %arg7[%399, %c0_194], %397 {strides = array<i32>} : memref<8x128xf32, #tpu.memory_space<vmem>>, vector<8x128xf32>,
    %401 = arith.truncf %397 : vector<8x128xf32> to vector<8x128xbf16>
    %c8_i32_195 = arith.constant 8 : i32
    %402 = arith.muli %c0_i32, %c8_i32_195 : i32
    %403 = arith.index_cast %402 : i32 to index
    %c0_196 = arith.constant 0 : index
    %404 = vector.load %arg8[%403, %c0_196] : memref<8x128xbf16, #tpu.memory_space<vmem>>, vector<8x128xbf16>
    tpu.vector_store %arg8[%403, %c0_196], %401 {strides = array<i32>} : memref<8x128xbf16, #tpu.memory_space<vmem>>, vector<8x128xbf16>,
    %c1_i32_197 = arith.constant 1 : i32
    %c0_198 = arith.constant 0 : index
    %c0_199 = arith.constant 0 : index
    %405 = vector.load %arg8[%c0_198, %c0_199] : memref<8x128xbf16, #tpu.memory_space<vmem>>, vector<8x128xbf16>
    %c0_200 = arith.constant 0 : index
    %c0_201 = arith.constant 0 : index
    %406 = vector.load %arg4[%c0_200, %c0_201] : memref<256x128xbf16, #tpu.memory_space<vmem>>, vector<256x128xbf16>
    %cst_202 = arith.constant dense<0.000000e+00> : vector<8x256xf32>
    %407 = tpu.matmul %405, %406, %cst_202 {dimension_numbers = #tpu.dot_dimension_numbers<[1], [1], [0], [0], [0, 0, 1, 0], [], []>} : vector<8x128xbf16>, vector<256x128xbf16>, vector<8x256xf32> -> vector<8x256xf32>
    %c0_203 = arith.constant 0 : index
    %c0_204 = arith.constant 0 : index
    %408 = vector.load %arg5[%c0_203, %c0_204] : memref<1x256xf32, #tpu.memory_space<vmem>>, vector<1x256xf32>
    %409 = vector.broadcast %408 : vector<1x256xf32> to vector<8x256xf32>
    %410 = arith.addf %407, %409 : vector<8x256xf32>
    %c0_205 = arith.constant 0 : index
    %c0_206 = arith.constant 0 : index
    %411 = vector.load %arg6[%c0_205, %c0_206] : memref<8x256xf32, #tpu.memory_space<vmem>>, vector<8x256xf32>
    tpu.vector_store %arg6[%c0_205, %c0_206], %410 {strides = array<i32>} : memref<8x256xf32, #tpu.memory_space<vmem>>, vector<8x256xf32>,
    return
  }
  func.func @transform_0(%arg0: i32, %arg1: i32, %arg2: memref<48xi32, #tpu.memory_space<smem>>) -> (i32, i32) {
    %c0_i32 = arith.constant 0 : i32
    %c0_i32_0 = arith.constant 0 : i32
    %c0_i32_1 = arith.constant 0 : i32
    return %c0_i32, %c0_i32_0 : i32, i32
  }
  func.func @transform_1(%arg0: i32, %arg1: i32, %arg2: memref<48xi32, #tpu.memory_space<smem>>) -> (i32, i32) {
    %c0_i32 = arith.constant 0 : i32
    %c0_i32_0 = arith.constant 0 : i32
    return %arg1, %c0_i32 : i32, i32
  }
  func.func @transform_2(%arg0: i32, %arg1: i32, %arg2: memref<48xi32, #tpu.memory_space<smem>>) -> (i32, i32) {
    %c0_i32 = arith.constant 0 : i32
    %c0_i32_0 = arith.constant 0 : i32
    return %c0_i32, %arg1 : i32, i32
  }
  func.func @transform_3(%arg0: i32, %arg1: i32, %arg2: memref<48xi32, #tpu.memory_space<smem>>) -> (i32, i32) {
    %c0_i32 = arith.constant 0 : i32
    return %arg0, %arg1 : i32, i32
  }
}

</mosaic_0001>

<bundles_post_ra>
// kernel: tpu_custom_call.1
= control target key start
LH: loop header
LB: loop body
LE: loop exit
PB: predicated region body
PF: predicated region fallthrough
CT: control target
= control target key end

     0   :  { %s765_s15 = smov [#allocation5]   ;;  %s946_s0 = inlined_call_operand.hbm [shape: s32[48], index: 0, kind: input, shape index: {}]   ;;  %s947_s1 = inlined_call_operand.hbm [shape: f32[200,128], index: 1, kind: input, shape index: {}]   ;;  %s948_s2 = inlined_call_operand.hbm [shape: bf16[256,128], index: 2, kind: input, shape index: {}]   ;;  %s949_s3 = inlined_call_operand.vmem [shape: f32[1,256], index: 3, kind: input, shape index: {}]   ;;  %s950_s4 = inlined_call_operand.hbm [shape: f32[8,256], index: 4, kind: output, shape index: {}]  }
   0x1   :  { %10 = dma.hbm_to_smem %s946_s0, 16, %s765_s15, [#allocation4] }
   0x2   :  { %757 = dma.done.wait [#allocation4], 16 }
   0x3   :  { %758 = vsyncadd [#allocation4], 4294967280 }
   0x4   :  { %12 = sfence }
   0x5   :  { %13 = vsyncpa [#allocation7], 0 }
   0x6   :  { %14 = vsyncpa [#allocation10], 0 }
   0x7   :  { %15 = vsyncpa [#allocation8], 0  ;;  %s766_s18 = smov [#allocation6]  }
   0x8   :  { %s21_s19 = sshll.u32 %s766_s18, 4  ;;  %s22_s19 = int_to_ptr.vmem [resolvable:$true] %s21_s19 }
   0x9   :  { %s705_s20 = scalar_lea.vmem %s22_s19, 3200  ;;  %p710_p1 = scmp.lt.s32.totalorder %s22_s19, %s22_s19 }
   0xa   :  { %p706_p0 = scmp.ne.s32.totalorder %s22_s19, %s705_s20  ;;  %p711_p2 = scmp.lt.s32.totalorder %s705_s20, %s705_s20 }
   0xc   :  { %p712_p3 = por %p711_p2, %p710_p1 }
   0xe   :  { %p713_p4 = pnand %p712_p3, %p706_p0 }
  0x10   :  { %716 = shalt.err (!%p713_p4)
}
  0x11   :  { %s767_s21 = smov 128   ;;  %s768_s22 = smov 8  }
  0x12   :  { %27 = dma.hbm_to_vmem [thread:$0]  %s947_s1, 3200, %s22_s19, [#allocation7], %s767_s21, %s767_s21, %s768_s22  }
  0x13   :  { %s769_s24 = smov [#allocation9]  }
  0x14   :  { %s33_s25 = sshll.u32 %s769_s24, 4  ;;  %s34_s25 = int_to_ptr.vmem [resolvable:$true] %s33_s25 }
  0x15   :  { %s725_s26 = scalar_lea.vmem %s34_s25, 2048  ;;  %p730_p6 = scmp.lt.s32.totalorder %s34_s25, %s34_s25 }
  0x16   :  { %p726_p5 = scmp.ne.s32.totalorder %s34_s25, %s725_s26  ;;  %p731_p7 = scmp.lt.s32.totalorder %s725_s26, %s725_s26 }
  0x18   :  { %p732_p8 = por %p731_p7, %p730_p6 }
  0x1a   :  { %p733_p9 = pnand %p732_p8, %p726_p5 }
  0x1c   :  { %736 = shalt.err (!%p733_p9)
}
  0x1d   :  { %s770_s27 = smov 64   ;;  %s771_s28 = smov 4  }
  0x1e   :  { %39 = dma.hbm_to_vmem [thread:$0]  %s948_s2, 2048, %s34_s25, [#allocation10], %s770_s27, %s770_s27, %s771_s28  }
  0x1f   :  { %759 = dma.done.wait [#allocation7], 3200  }
  0x20   :  { %760 = vsyncadd [#allocation7], 4294964096 }
  0x21   :  { %761 = dma.done.wait [#allocation10], 2048  }
  0x22   :  { %762 = vsyncadd [#allocation10], 4294965248  ;;  %v673_v0 = vld [vmem:[#allocation9 + $0x78] sm:$0xff]   ;;  %v675_v2 = vld [vmem:[#allocation9 + $0x70] sm:$0xff]   ;;  %s807_s1 = sld [smem:[#allocation5]]  ;;  %vm318_vm0 = vcmask 1040384  }
  0x23   :  { %v674_v1 = vld [vmem:[#allocation9 + $0x38] sm:$0xff]   ;;  %647 = vmatprep.subr.bf16.mxu0 %v673_v0  ;;  %v676_v3 = vld [vmem:[#allocation9 + $0x30] sm:$0xff]   ;;  %v677_v4 = vld [vmem:[#allocation9 + $0x68] sm:$0xff]   ;;  %s809_s5 = sld [smem:[#allocation5 + $0x1]]  ;;  %vm320_vm1 = vcmask 1041408   ;;  %vm322_vm2 = vcmask 1042432  }
  0x24   :  { %648 = vmatpush3.bf16.xpose.msra.mxu0 %v674_v1  ;;  %s811_s6 = sld [smem:[#allocation5 + $0x2]]  ;;  %v678_v5 = vld [vmem:[#allocation9 + $0x28] sm:$0xff]   ;;  %v679_v6 = vld [vmem:[#allocation9 + $0x60] sm:$0xff]   ;;  %v681_v8 = vld [vmem:[#allocation9 + $0x58] sm:$0xff]   ;;  %vm324_vm3 = vcmask 1043456   ;;  %vm326_vm4 = vcmask 1044480  }
  0x25   :  { %649 = vmatprep.subr.bf16.mxu0 %v675_v2  ;;  %s813_s2 = sld [smem:[#allocation5 + $0x3]]  ;;  %v680_v7 = vld [vmem:[#allocation9 + $0x20] sm:$0xff]   ;;  %v682_v11 = vld [vmem:[#allocation9 + $0x18] sm:$0xff]   ;;  %v683_v12 = vld [vmem:[#allocation9 + $0x50] sm:$0xff]   ;;  %vm328_vm5 = vcmask 1045504   ;;  %vm330_vm6 = vcmask 1046528  }
  0x26   :  { %s815_s7 = sld [smem:[#allocation5 + $0x4]]  ;;  %v684_v27 = vld [vmem:[#allocation9 + $0x10] sm:$0xff]   ;;  %v685_v29 = vld [vmem:[#allocation9 + $0x48] sm:$0xff]   ;;  %v687_v54 = vld [vmem:[#allocation9 + $0x40] sm:$0xff]  }
  0x27   :  { %s817_s8 = sld [smem:[#allocation5 + $0x5]]  ;;  %v686_v49 = vld [vmem:[#allocation9 + $0x8] sm:$0xff]  }
  0x28   :  { %s589_s9 = sld [smem:[#allocation5 + $0x6]]  ;;  %s52_s24 = scalar_lea.vmem [#allocation6], %s807_s1 }
  0x29   :  { %s590_s10 = sld [smem:[#allocation5 + $0x7]]  ;;  %v53_v13 = vld [vmem:[%s52_s24] sm:$0x1]  ;;  %s57_s25 = scalar_lea.vmem [#allocation6], %s809_s5 }
  0x2a   :  { %s819_s11 = sld [smem:[#allocation5 + $0x8]]  ;;  %v58_v14 = vld [vmem:[%s57_s25] sm:$0x1]  ;;  %s62_s5 = scalar_lea.vmem [#allocation6], %s811_s6 }
  0x2b   :  { %s821_s12 = sld [smem:[#allocation5 + $0x9]]  ;;  %v63_v19 = vld [vmem:[%s62_s5] sm:$0x1]  ;;  %v59_v23 = vadd.f32 %v58_v14, %v53_v13 }
  0x2c   :  { %650 = vmatpush3.bf16.xpose.msra.mxu0 %v676_v3  ;;  %s823_s13 = sld [smem:[#allocation5 + $0xa]] }
  0x2d   :  { %651 = vmatprep.subr.bf16.mxu0 %v677_v4  ;;  %s825_s14 = sld [smem:[#allocation5 + $0xb]]  ;;  %v64_v34 = vadd.f32 %v63_v19, %v59_v23 }
  0x2e   :  { %s595_s15 = sld [smem:[#allocation5 + $0xc]]  ;;  %s83_s20 = scalar_lea.vmem [#allocation6], %s589_s9 }
  0x2f   :  { %s596_s16 = sld [smem:[#allocation5 + $0xd]]  ;;  %v84_v9 = vld [vmem:[%s83_s20] sm:$0x1]  ;;  %s88_s22 = scalar_lea.vmem [#allocation6], %s590_s10 }
  0x30   :  { %s827_s17 = sld [smem:[#allocation5 + $0xe]]  ;;  %v89_v10 = vld [vmem:[%s88_s22] sm:$0x1]  ;;  %s93_s30 = scalar_lea.vmem [#allocation6], %s819_s11 }
  0x31   :  { %s829_s18 = sld [smem:[#allocation5 + $0xf]]  ;;  %v90_v16 = vadd.f32 %v89_v10, %v84_v9  ;;  %v94_v18 = vld [vmem:[%s93_s30] sm:$0x1]  ;;  %s98_s10 = scalar_lea.vmem [#allocation6], %s821_s12 }
  0x32   :  { %s831_s19 = sld [smem:[#allocation5 + $0x10]]  ;;  %v99_v20 = vld [vmem:[%s98_s10] sm:$0x1]  ;;  %s103_s24 = scalar_lea.vmem [#allocation6], %s823_s13 }
  0x33   :  { %s833_s21 = sld [smem:[#allocation5 + $0x11]]  ;;  %v95_v24 = vadd.f32 %v94_v18, %v90_v16  ;;  %v104_v31 = vld [vmem:[%s103_s24] sm:$0x1] }
  0x34   :  { %652 = vmatpush3.bf16.xpose.msra.mxu0 %v678_v5  ;;  %s835_s23 = sld [smem:[#allocation5 + $0x12]]  ;;  %s114_s26 = scalar_lea.vmem [#allocation6], %s595_s15 }
  0x35   :  { %653 = vmatprep.subr.bf16.mxu0 %v679_v6  ;;  %s837_s0 = sld [smem:[#allocation5 + $0x13]]  ;;  %v115_v15 = vld [vmem:[%s114_s26] sm:$0x1]  ;;  %s119_s28 = scalar_lea.vmem [#allocation6], %s596_s16  ;;  %v100_v35 = vadd.f32 %v99_v20, %v95_v24 }
  0x36   :  { %s841_s27 = sld [smem:[#allocation5 + $0x14]]  ;;  %v120_v17 = vld [vmem:[%s119_s28] sm:$0x1]  ;;  %s124_s15 = scalar_lea.vmem [#allocation6], %s827_s17 }
  0x37   :  { %s843_s29 = sld [smem:[#allocation5 + $0x15]]  ;;  %v121_v21 = vadd.f32 %v120_v17, %v115_v15  ;;  %v125_v22 = vld [vmem:[%s124_s15] sm:$0x1]  ;;  %s67_s17 = scalar_lea.vmem [#allocation6], %s813_s2  ;;  %v105_v45 = vadd.f32 %v104_v31, %v100_v35 }
  0x38   :  { %s846_s9 = sld [smem:[#allocation5 + $0x16]]  ;;  %v68_v30 = vld [vmem:[%s67_s17] sm:$0x1]  ;;  %s129_s25 = scalar_lea.vmem [#allocation6], %s829_s18 }
  0x39   :  { %s848_s1 = sld [smem:[#allocation5 + $0x17]]  ;;  %v126_v32 = vadd.f32 %v125_v22, %v121_v21  ;;  %v130_v36 = vld [vmem:[%s129_s25] sm:$0x1]  ;;  %s134_s13 = scalar_lea.vmem [#allocation6], %s831_s19  ;;  %v69_v44 = vadd.f32 %v68_v30, %v64_v34 }
  0x3a   :  { %s853_s16 = sld [smem:[#allocation5 + $0x18]]  ;;  %s145_s11 = scalar_lea.vmem [#allocation6], %s835_s23  ;;  %v135_v38 = vld [vmem:[%s134_s13] sm:$0x1] }
  0x3b   :  { %v146_v25 = vld [vmem:[%s145_s11] sm:$0x1]  ;;  %s856_s20 = sld [smem:[#allocation5 + $0x19]]  ;;  %s150_s22 = scalar_lea.vmem [#allocation6], %s837_s0  ;;  %v131_v42 = vadd.f32 %v130_v36, %v126_v32 }
  0x3c   :  { %654 = vmatpush3.bf16.xpose.msra.mxu0 %v680_v7  ;;  %v151_v26 = vld [vmem:[%s150_s22] sm:$0x1]  ;;  %s859_s6 = sld [smem:[#allocation5 + $0x1a]]  ;;  %s155_s23 = scalar_lea.vmem [#allocation6], %s841_s27 }
  0x3d   :  { %655 = vmatprep.subr.bf16.mxu0 %v681_v8  ;;  %v152_v28 = vadd.f32 %v151_v26, %v146_v25  ;;  %s861_s12 = sld [smem:[#allocation5 + $0x1b]]  ;;  %v156_v33 = vld [vmem:[%s155_s23] sm:$0x1]  ;;  %s160_s28 = scalar_lea.vmem [#allocation6], %s843_s29  ;;  %v136_v56 = vadd.f32 %v135_v38, %v131_v42 }
  0x3e   :  { %s866_s0 = sld [smem:[#allocation5 + $0x1c]]  ;;  %v161_v37 = vld [vmem:[%s160_s28] sm:$0x1]  ;;  %s72_s18 = scalar_lea.vmem [#allocation6], %s815_s7 }
  0x3f   :  { %s869_s26 = sld [smem:[#allocation5 + $0x1d]]  ;;  %v157_v39 = vadd.f32 %v156_v33, %v152_v28  ;;  %v73_v41 = vld [vmem:[%s72_s18] sm:$0x1]  ;;  %s108_s15 = scalar_lea.vmem [#allocation6], %s825_s14 }
  0x40   :  { %s872_s2 = sld [smem:[#allocation5 + $0x1e]]  ;;  %s176_s27 = scalar_lea.vmem [#allocation6], %s853_s16  ;;  %v109_v48 = vld [vmem:[%s108_s15] sm:$0x1]  ;;  %v74_v58 = vadd.f32 %v73_v41, %v69_v44 }
  0x41   :  { %v177_v40 = vld [vmem:[%s176_s27] sm:$0x1]  ;;  %s876_s30 = sld [smem:[#allocation5 + $0x1f]]  ;;  %s181_s5 = scalar_lea.vmem [#allocation6], %s856_s20  ;;  %v162_v51 = vadd.f32 %v161_v37, %v157_v39  ;;  %v110_v59 = vadd.f32 %v109_v48, %v105_v45 }
  0x42   :  { %v182_v43 = vld [vmem:[%s181_s5] sm:$0x1]  ;;  %s880_s29 = sld [smem:[#allocation5 + $0x20]]  ;;  %s186_s19 = scalar_lea.vmem [#allocation6], %s859_s6 }
  0x43   :  { %v183_v46 = vadd.f32 %v182_v43, %v177_v40  ;;  %v187_v47 = vld [vmem:[%s186_s19] sm:$0x1]  ;;  %s883_s10 = sld [smem:[#allocation5 + $0x21]]  ;;  %s139_s16 = scalar_lea.vmem [#allocation6], %s833_s21  ;;  %v298_v9 = vrot.slane %v110_v59, 7 }
  0x44   :  { %656 = vmatpush3.bf16.xpose.msra.mxu0 %v682_v11  ;;  %s886_s7 = sld [smem:[#allocation5 + $0x22]]  ;;  %v140_v50 = vld [vmem:[%s139_s16] sm:$0x1]  ;;  %s191_s11 = scalar_lea.vmem [#allocation6], %s861_s12 }
  0x45   :  { %657 = vmatprep.subr.bf16.mxu0 %v683_v12  ;;  %v188_v52 = vadd.f32 %v187_v47, %v183_v46  ;;  %v192_v53 = vld [vmem:[%s191_s11] sm:$0x1]  ;;  %s890_s20 = sld [smem:[#allocation5 + $0x23]]  ;;  %s77_s22 = scalar_lea.vmem [#allocation6], %s817_s8  ;;  %v141_v4 = vadd.f32 %v140_v50, %v136_v56  ;;  %v688_v12 = vld [vmem:[#allocation9] sm:$0xff]  }
  0x46   :  { %v78_v55 = vld [vmem:[%s77_s22] sm:$0x1]  ;;  %s165_s14 = scalar_lea.vmem [#allocation6], %s846_s9  ;;  %s894_s6 = sld [smem:[#allocation5 + $0x24]] }
  0x47   :  { %v166_v57 = vld [vmem:[%s165_s14] sm:$0x1]  ;;  %s196_s21 = scalar_lea.vmem [#allocation6], %s866_s0  ;;  %s207_s17 = scalar_lea.vmem [#allocation6], %s872_s2  ;;  %v193_v63 = vadd.f32 %v192_v53, %v188_v52  ;;  %v79_v6 = vadd.f32 %v78_v55, %v74_v58  ;;  %v301_v18 = vrot.slane %v141_v4, 6 }
  0x48   :  { %v197_v60 = vld [vmem:[%s196_s21] sm:$0x1]  ;;  %s898_s12 = sld [smem:[#allocation5 + $0x25]]  ;;  %s170_s24 = scalar_lea.vmem [#allocation6], %s848_s1  ;;  %v167_v1 = vadd.f32 %v166_v57, %v162_v51  ;;  %v371_v57 = vlaneseq }
  0x49   :  { %v208_v61 = vld [vmem:[%s207_s17] sm:$0x1]  ;;  %s212_s8 = scalar_lea.vmem [#allocation6], %s876_s30  ;;  %s902_s9 = sld [smem:[#allocation5 + $0x26]]  ;;  %v198_v10 = vadd.f32 %v197_v60, %v193_v63  ;;  %v319_v22 = vsel %vm318_vm0, %v79_v6, %v298_v9 }
  0x4a   :  { %v171_v62 = vld [vmem:[%s170_s24] sm:$0x1]  ;;  %s217_s23 = scalar_lea.vmem [#allocation6], %s880_s29  ;;  %s905_s0 = sld [smem:[#allocation5 + $0x27]]  ;;  %v321_v28 = vsel %vm320_vm1, %v319_v22, %v301_v18  ;;  %v372_v58 = vshrl.u32 %v371_v57, 7 }
  0x4b   :  { %v213_v0 = vld [vmem:[%s212_s8] sm:$0x1]  ;;  %s222_s25 = scalar_lea.vmem [#allocation6], %s883_s10  ;;  %s908_s1 = sld [smem:[#allocation5 + $0x28]]  ;;  %v172_v13 = vadd.f32 %v171_v62, %v167_v1 }
  0x4c   :  { %658 = vmatpush3.bf16.xpose.msra.mxu0 %v684_v27  ;;  %v214_v2 = vadd.f32 %v213_v0, %v208_v61  ;;  %v218_v3 = vld [vmem:[%s217_s23] sm:$0x1]  ;;  %s201_s28 = scalar_lea.vmem [#allocation6], %s869_s26  ;;  %s911_s2 = sld [smem:[#allocation5 + $0x29]]  ;;  %v373_v59 = vsub.s32 0, %v372_v58  ;;  %v377_v61 = vsub.s32 1, %v372_v58 }
  0x4d   :  { %659 = vmatprep.subr.bf16.mxu0 %v685_v29  ;;  %v223_v5 = vld [vmem:[%s222_s25] sm:$0x1]  ;;  %s227_s13 = scalar_lea.vmem [#allocation6], %s886_s7  ;;  %s914_s27 = sld [smem:[#allocation5 + $0x2a]]  ;;  %v304_v26 = vrot.slane %v172_v13, 5 }
  0x4e   :  { %v202_v7 = vld [vmem:[%s201_s28] sm:$0x1]  ;;  %v219_v8 = vadd.f32 %v218_v3, %v214_v2  ;;  %s238_s30 = scalar_lea.vmem [#allocation6], %s894_s6  ;;  %s917_s26 = sld [smem:[#allocation5 + $0x2b]] }
  0x4f   :  { %v228_v11 = vld [vmem:[%s227_s13] sm:$0x1]  ;;  %s232_s18 = scalar_lea.vmem [#allocation6], %s890_s20  ;;  %s243_s5 = scalar_lea.vmem [#allocation6], %s898_s12  ;;  %v203_v23 = vadd.f32 %v202_v7, %v198_v10  ;;  %v323_v38 = vsel %vm322_vm2, %v321_v28, %v304_v26 }
  0x50   :  { %v224_v14 = vadd.f32 %v223_v5, %v219_v8  ;;  %v239_v15 = vld [vmem:[%s238_s30] sm:$0x1]  ;;  %s921_s29 = sld [smem:[#allocation5 + $0x2c]]  ;;  %s248_s19 = scalar_lea.vmem [#allocation6], %s902_s9 }
  0x51   :  { %v233_v16 = vld [vmem:[%s232_s18] sm:$0x1]  ;;  %s924_s10 = sld [smem:[#allocation5 + $0x2d]]  ;;  %s253_s15 = scalar_lea.vmem [#allocation6], %s905_s0  ;;  %v307_v34 = vrot.slane %v203_v23, 4 }
  0x52   :  { %v244_v17 = vld [vmem:[%s243_s5] sm:$0x1]  ;;  %v229_v19 = vadd.f32 %v228_v11, %v224_v14  ;;  %s928_s7 = sld [smem:[#allocation5 + $0x2e]]  ;;  %s258_s11 = scalar_lea.vmem [#allocation6], %s908_s1 }
  0x53   :  { %v245_v20 = vadd.f32 %v244_v17, %v239_v15  ;;  %v249_v21 = vld [vmem:[%s248_s19] sm:$0x1]  ;;  %s930_s16 = sld [smem:[#allocation5 + $0x2f]]  ;;  %s269_s20 = scalar_lea.vmem [#allocation6], %s914_s27  ;;  %v325_v44 = vsel %vm324_vm3, %v323_v38, %v307_v34 }
  0x54   :  { %660 = vmatpush3.bf16.xpose.msra.mxu0 %v686_v49  ;;  %v254_v24 = vld [vmem:[%s253_s15] sm:$0x1]  ;;  %v234_v29 = vadd.f32 %v233_v16, %v229_v19  ;;  %s263_s22 = scalar_lea.vmem [#allocation6], %s911_s2  ;;  %s274_s14 = scalar_lea.vmem [#allocation6], %s917_s26 }
  0x55   :  { %661 = vmatprep.subr.bf16.mxu0 %v687_v54  ;;  %v250_v25 = vadd.f32 %v249_v21, %v245_v20  ;;  %v259_v27 = vld [vmem:[%s258_s11] sm:$0x1]  ;;  %s772_s9 = smov [#allocation11]  }
  0x56   :  { %v270_v31 = vld [vmem:[%s269_s20] sm:$0x1]  ;;  %s279_s6 = scalar_lea.vmem [#allocation6], %s921_s29  ;;  %v310_v42 = vrot.slane %v234_v29, 3  ;;  %s526_s23 = sshll.u32 %s772_s9, 4  ;;  %s527_s23 = int_to_ptr.vmem [resolvable:$true] %s526_s23 }
  0x57   :  { %v255_v30 = vadd.f32 %v254_v24, %v250_v25  ;;  %v264_v32 = vld [vmem:[%s263_s22] sm:$0x1]  ;;  %s284_s21 = scalar_lea.vmem [#allocation6], %s924_s10  ;;  %s737_s0 = scalar_lea.vmem %s527_s23, 256 }
  0x58   :  { %v275_v33 = vld [vmem:[%s274_s14] sm:$0x1]  ;;  %s289_s17 = scalar_lea.vmem [#allocation6], %s928_s7  ;;  %v327_v49 = vsel %vm326_vm4, %v325_v44, %v310_v42  ;;  %p738_p10 = scmp.ne.s32.totalorder %s527_s23, %s737_s0 }
  0x59   :  { %v260_v35 = vadd.f32 %v259_v27, %v255_v30  ;;  %v276_v36 = vadd.f32 %v275_v33, %v270_v31  ;;  %v280_v37 = vld [vmem:[%s279_s6] sm:$0x1]  ;;  %s294_s12 = scalar_lea.vmem [#allocation6], %s930_s16  ;;  %p742_p11 = scmp.lt.s32.totalorder %s527_s23, %s527_s23 }
  0x5a   :  { %v285_v39 = vld [vmem:[%s284_s21] sm:$0x1]  ;;  %p743_p12 = scmp.lt.s32.totalorder %s737_s0, %s737_s0 }
  0x5b   :  { %v265_v40 = vadd.f32 %v264_v32, %v260_v35  ;;  %v281_v41 = vadd.f32 %v280_v37, %v276_v36  ;;  %v290_v43 = vld [vmem:[%s289_s17] sm:$0x1] }
  0x5c   :  { %662 = vmatpush3.bf16.xpose.msra.mxu0 %v688_v12  ;;  %v295_v46 = vld [vmem:[%s294_s12] sm:$0x1]  ;;  %p744_p13 = por %p743_p12, %p742_p11 }
  0x5d   :  { %v286_v45 = vadd.f32 %v285_v39, %v281_v41  ;;  %v313_v47 = vrot.slane %v265_v40, 2  ;;  %v369_v60 = vld [vmem:[%s949_s3] sm:$0x3] }
  0x5e   :  { %v374_v62 = vrot.slane %v369_v60, %v373_v59  ;;  %v378_v63 = vrot.slane %v369_v60, %v377_v61  ;;  %p745_p0 = pnand %p744_p13, %p738_p10 }
  0x5f   :  { %v291_v48 = vadd.f32 %v290_v43, %v286_v45  ;;  %v329_v51 = vsel %vm328_vm5, %v327_v49, %v313_v47 }
  0x61   :  { %v296_v50 = vadd.f32 %v295_v46, %v291_v48 }
  0x63   :  { %v316_v52 = vrot.slane %v296_v50, 1 }
  0x65   :  { %v331_v53 = vsel %vm330_vm6, %v329_v51, %v316_v52 }
  0x66   :  { %v332_v54 = vmul.f32 0.16666667, %v331_v53 }
  0x68   :  { %v334_v55 = vpack.c.bf16 %v332_v54, %v332_v54 }
  0x6a   :  { %335 = vst [vmem:[#allocation3] sm:$0xf] %v334_v55 }
  0x71   :  { %v336_v56 = vld [vmem:[#allocation3] sm:$0xf] }
  0x72   :  { %663 = vmatprep.mubr.bf16.mxu0 %v336_v56 }
  0x73   :  { %664 = vmatmul.mubr.bf16.vlgmr.msra.gmra.mxu0 %v336_v56 }
 0x133   :  { %v511_v0 = vpop.f32.mrf.mxu0 }
 0x134   :  { %v512_v1 = vadd.f32 %v511_v0, %v374_v62 }
 0x135   :  { %v513_v2 = vpop.f32.mrf.mxu0 }
 0x136   :  { %518 = vst [vmem:[#allocation11] sm:$0xff] %v512_v1  ;;  %v514_v3 = vadd.f32 %v513_v2, %v378_v63 }
 0x137   :  { %v515_v4 = vpop.f32.mrf.mxu0 }
 0x138   :  { %519 = vst [vmem:[#allocation11 + $0x8] sm:$0xff] %v514_v3 }
 0x139   :  { %v516_v5 = vpop.f32.mrf.mxu0 }
 0x13a   :  { %748 = shalt.err (!%p745_p0)
}
 0x13b   :  { %529 = dma.vmem_to_hbm [thread:$0]  %s527_s23, 256, %s950_s4, [#allocation8]  }
 0x13c   :  { %763 = dma.done.wait [#allocation8], 256  }
 0x13d   :  { %764 = vsyncadd [#allocation8], 4294967040 }
 0x13e   :  { %533 = vsyncpa [#allocation7], 1 }
 0x13f   :  { %534 = vsyncpa [#allocation10], 1 }
 0x140   :  { %535 = vsyncpa [#allocation8], 1 }

</bundles_post_ra>
